<compile_context>
chip_gen: v6e
topology: v6e:2x2x1
jax: 0.10.0
libtpu: 0.0.40
codegen_flags: <defaults>
</compile_context>

<pallas_src>
import jax
import jax.numpy as jnp
from jax import lax
from jax.experimental import pallas as pl
from jax.experimental.pallas import tpu as pltpu


def _cdiv(a, b):
    return -(-a // b)


def _round_up(a, b):
    return _cdiv(a, b) * b


def _mlp_kernel(x_ref, w1_ref, b1_ref, w2_ref, b2_ref, o_ref):
    # x_ref:  (tile, F)  activations (batch on sublanes, features on lanes)
    # w1_ref: (F, H)     first-layer weight, (in, out) layout (resident, fetched once)
    # b1_ref: (1, H)
    # w2_ref: (O, H)     second-layer weight in (out, in) layout
    # b2_ref: (O, 1)
    # o_ref:  (O, tile)  lane-dense output row (batch along lanes)
    x = x_ref[...]
    h = jnp.dot(x, w1_ref[...], preferred_element_type=jnp.float32) + b1_ref[...]
    h = jnp.maximum(h, 0.0)  # ReLU
    # Layer 2 as an NT matmul: (O, H) . (tile, H)^T -> (O, tile). Avoids the degenerate N=1
    # MXU shape and directly produces the lane-dense (batch-on-lanes) output row.
    y = lax.dot_general(w2_ref[...], h, (((1,), (1,)), ((), ())),
                        preferred_element_type=jnp.float32)
    y = y + b2_ref[...]
    # Exact sigmoid (exp on the EUP, true divide) for parity with PyTorch; HBM-bound so free.
    o_ref[...] = (1.0 / (1.0 + jnp.exp(-y))).astype(o_ref.dtype)


def sample_model_forward(x, w1, b1, w2, b2, *, tile_b=8192, vmem_limit_bytes=None):
    """Fused forward pass of SampleModel.

    x:  (B, F) float32 or bfloat16 (bf16 is consumed directly; f32 accumulation on the MXU)
    w1: (F, H)   (PyTorch linear1.weight.T)
    b1: (H,)
    w2: (H, O)   (PyTorch linear2.weight.T), O == 1 for this model
    b2: (O,)
    Returns (B, O) float32.
    """
    B, F = x.shape
    H = w1.shape[1]
    O = w2.shape[1]

    # Do NOT cast x in the wrapper (that would be an extra HBM pass). Weights follow x's
    # dtype only when the caller hands over bf16; biases / accumulation stay f32.
    w_dtype = jnp.bfloat16 if x.dtype == jnp.bfloat16 else jnp.float32
    w1c = w1.astype(w_dtype)
    b1_2d = b1.reshape(1, H).astype(jnp.float32)
    w2_rows = w2.T.reshape(O, H).astype(w_dtype)  # (out, in) layout for the NT matmul
    b2_2d = b2.reshape(O, 1).astype(jnp.float32)

    # Batch tile: large by default (multiple of 128), clamped to the batch so tiny demos do
    # not over-allocate, and capped at ~ceil(B/2) for B > 256 so the "parallel" grid axis
    # gives both v7x TensorCores work.
    tile = max(128, (int(tile_b) // 128) * 128)
    tile = min(tile, _round_up(B, 128))
    if B > 256:
        tile = min(tile, _round_up(_cdiv(B, 2), 128))
    num_tiles = _cdiv(B, tile)  # last block may be partial: OOB reads are undefined but only
                                # feed OOB output lanes, whose stores Pallas masks.

    # Double-buffered x tiles dominate VMEM; raise the scoped limit only when needed and cap
    # at 48 MiB to leave headroom on v7x's 64 MiB physical VMEM.
    x_itemsize = jnp.dtype(x.dtype).itemsize
    x_tile_bytes = 2 * tile * F * x_itemsize
    if vmem_limit_bytes is None and x_tile_bytes > 8 * 1024 * 1024:
        vmem_limit_bytes = min(int(2.5 * x_tile_bytes) + (8 << 20), 48 << 20)

    w_itemsize = jnp.dtype(w_dtype).itemsize
    cost = pl.CostEstimate(
        flops=2 * B * F * H + 2 * B * H * O,
        transcendentals=2 * B * O,  # exp + reciprocal per output
        bytes_accessed=(B * F * x_itemsize            # x read (dominant)
                        + (F * H + O * H) * w_itemsize  # weights
                        + (H + O) * 4                   # biases
                        + O * B * 4),                   # output write
    )

    out_row = pl.pallas_call(
        _mlp_kernel,
        out_shape=jax.ShapeDtypeStruct((O, B), jnp.float32),
        grid_spec=pltpu.PrefetchScalarGridSpec(
            num_scalar_prefetch=0,
            grid=(num_tiles,),
            in_specs=[
                pl.BlockSpec((tile, F), lambda i: (i, 0)),   # x batch tile (streamed)
                pl.BlockSpec((F, H), lambda i: (0, 0)),      # w1 (resident)
                pl.BlockSpec((1, H), lambda i: (0, 0)),      # b1
                pl.BlockSpec((O, H), lambda i: (0, 0)),      # w2 rows
                pl.BlockSpec((O, 1), lambda i: (0, 0)),      # b2
            ],
            out_specs=pl.BlockSpec((O, tile), lambda i: (0, i)),  # lane-dense output slab
        ),
        compiler_params=pltpu.CompilerParams(
            dimension_semantics=("parallel",),  # v7x: shard batch tiles across both TCs
            vmem_limit_bytes=vmem_limit_bytes,
        ),
        cost_estimate=cost,
    )(x, w1c, b1_2d, w2_rows, b2_2d)

    # (O, B) lane-dense slab -> (B, O); trivial layout plumbing on O*B elements.
    return out_row.T


def _reference(x, w1, b1, w2, b2):
    h = jnp.maximum(x.astype(jnp.float32) @ w1 + b1, 0.0)
    return jax.nn.sigmoid(h @ w2 + b2)


if __name__ == "__main__":
    key = jax.random.PRNGKey(0)
    k_x, k_w1, k_b1, k_w2, k_b2 = jax.random.split(key, 5)

    B = 200      # deliberately NOT a multiple of 128 -> exercises the partial final block
    IN_F = 32    # in_features
    HID = 20     # linear1 out_features
    OUT = 1      # linear2 out_features

    x = jax.random.normal(k_x, (B, IN_F), dtype=jnp.float32)

    # Deterministic "nn.Linear"-style init (uniform in +-1/sqrt(fan_in)), stored as (in, out).
    lim1 = 1.0 / jnp.sqrt(jnp.float32(IN_F))
    w1 = jax.random.uniform(k_w1, (IN_F, HID), jnp.float32, -lim1, lim1)
    b1 = jax.random.uniform(k_b1, (HID,), jnp.float32, -lim1, lim1)
    lim2 = 1.0 / jnp.sqrt(jnp.float32(HID))
    w2 = jax.random.uniform(k_w2, (HID, OUT), jnp.float32, -lim2, lim2)
    b2 = jax.random.uniform(k_b2, (OUT,), jnp.float32, -lim2, lim2)

    out = sample_model_forward(x, w1, b1, w2, b2)                     # single (partial) tile
    out_multi = sample_model_forward(x, w1, b1, w2, b2, tile_b=128)   # 2 tiles, partial tail
    out = jax.block_until_ready(out)
    out_multi = jax.block_until_ready(out_multi)

    ref = _reference(x, w1, b1, w2, b2)
    assert out.shape == (B, OUT)
    assert out_multi.shape == (B, OUT)
    assert jnp.allclose(out, ref, atol=1e-4, rtol=1e-4), "mismatch vs reference (single tile)"
    assert jnp.allclose(out_multi, ref, atol=1e-4, rtol=1e-4), "mismatch vs reference (multi tile)"

    print("KERNEL_OK")
</pallas_src>

<mosaic_0001>
module attributes {stable_mosaic.version = 11 : i64} {
  func.func @_mlp_kernel(%arg0: i32, %arg1: memref<256x32xf32, #tpu.memory_space<vmem>>, %arg2: memref<32x20xf32, #tpu.memory_space<vmem>>, %arg3: memref<1x20xf32, #tpu.memory_space<vmem>>, %arg4: memref<1x20xf32, #tpu.memory_space<vmem>>, %arg5: memref<1x1xf32, #tpu.memory_space<vmem>>, %arg6: memref<1x256xf32, #tpu.memory_space<vmem>>) attributes {dimension_semantics = [#tpu.dimension_semantics<parallel>], iteration_bounds = array<i64: 1>, scalar_prefetch = 0 : i64, scratch_operands = 0 : i64, tpu.core_type = #tpu.core_type<tc>, window_params = [{transform_indices = @transform_0, window_bounds = array<i64: 256, 32>}, {pipeline_mode = #tpu.pipeline_mode<synchronous>, transform_indices = @transform_1, window_bounds = array<i64: 32, 20>}, {pipeline_mode = #tpu.pipeline_mode<synchronous>, transform_indices = @transform_2, window_bounds = array<i64: 1, 20>}, {pipeline_mode = #tpu.pipeline_mode<synchronous>, transform_indices = @transform_3, window_bounds = array<i64: 1, 20>}, {pipeline_mode = #tpu.pipeline_mode<synchronous>, transform_indices = @transform_4, window_bounds = array<i64: 1, 1>}, {transform_indices = @transform_5, window_bounds = array<i64: 1, 256>}]} {
    %c0 = arith.constant 0 : index
    %c0_0 = arith.constant 0 : index
    %0 = vector.load %arg1[%c0, %c0_0] : memref<256x32xf32, #tpu.memory_space<vmem>>, vector<256x32xf32>
    %c0_1 = arith.constant 0 : index
    %c0_2 = arith.constant 0 : index
    %1 = vector.load %arg2[%c0_1, %c0_2] : memref<32x20xf32, #tpu.memory_space<vmem>>, vector<32x20xf32>
    %cst = arith.constant dense<0.000000e+00> : vector<256x20xf32>
    %2 = tpu.matmul %0, %1, %cst {dimension_numbers = #tpu.dot_dimension_numbers<[1], [0], [0], [1], [0, 0, 1, 1], [], []>} : vector<256x32xf32>, vector<32x20xf32>, vector<256x20xf32> -> vector<256x20xf32>
    %c0_3 = arith.constant 0 : index
    %c0_4 = arith.constant 0 : index
    %3 = vector.load %arg3[%c0_3, %c0_4] : memref<1x20xf32, #tpu.memory_space<vmem>>, vector<1x20xf32>
    %4 = vector.broadcast %3 : vector<1x20xf32> to vector<256x20xf32>
    %5 = arith.addf %2, %4 : vector<256x20xf32>
    %cst_5 = arith.constant 0.000000e+00 : f32
    %6 = vector.broadcast %cst_5 : f32 to vector<256x20xf32>
    %7 = arith.maximumf %5, %6 : vector<256x20xf32>
    %c0_6 = arith.constant 0 : index
    %c0_7 = arith.constant 0 : index
    %8 = vector.load %arg4[%c0_6, %c0_7] : memref<1x20xf32, #tpu.memory_space<vmem>>, vector<1x20xf32>
    %cst_8 = arith.constant dense<0.000000e+00> : vector<1x256xf32>
    %9 = tpu.matmul %8, %7, %cst_8 {dimension_numbers = #tpu.dot_dimension_numbers<[1], [1], [0], [0], [0, 0, 1, 0], [], []>} : vector<1x20xf32>, vector<256x20xf32>, vector<1x256xf32> -> vector<1x256xf32>
    %c0_9 = arith.constant 0 : index
    %c0_10 = arith.constant 0 : index
    %10 = vector.load %arg5[%c0_9, %c0_10] : memref<1x1xf32, #tpu.memory_space<vmem>>, vector<1x1xf32>
    %11 = vector.broadcast %10 : vector<1x1xf32> to vector<1x256xf32>
    %12 = arith.addf %9, %11 : vector<1x256xf32>
    %cst_11 = arith.constant 0.000000e+00 : f32
    %13 = vector.broadcast %cst_11 : f32 to vector<1x256xf32>
    %14 = arith.subf %13, %12 : vector<1x256xf32>
    %15 = math.exp %14 : vector<1x256xf32>
    %cst_12 = arith.constant 1.000000e+00 : f32
    %16 = vector.broadcast %cst_12 : f32 to vector<1x256xf32>
    %17 = arith.addf %16, %15 : vector<1x256xf32>
    %cst_13 = arith.constant 1.000000e+00 : f32
    %18 = vector.broadcast %cst_13 : f32 to vector<1x256xf32>
    %19 = arith.divf %18, %17 : vector<1x256xf32>
    %c0_14 = arith.constant 0 : index
    %c0_15 = arith.constant 0 : index
    %20 = vector.load %arg6[%c0_14, %c0_15] : memref<1x256xf32, #tpu.memory_space<vmem>>, vector<1x256xf32>
    tpu.vector_store %arg6[%c0_14, %c0_15], %19 {strides = array<i32>} : memref<1x256xf32, #tpu.memory_space<vmem>>, vector<1x256xf32>,
    return
  }
  func.func @transform_0(%arg0: i32) -> (i32, i32) {
    %c0_i32 = arith.constant 0 : i32
    %c0_i32_0 = arith.constant 0 : i32
    return %arg0, %c0_i32 : i32, i32
  }
  func.func @transform_1(%arg0: i32) -> (i32, i32) {
    %c0_i32 = arith.constant 0 : i32
    %c0_i32_0 = arith.constant 0 : i32
    %c0_i32_1 = arith.constant 0 : i32
    return %c0_i32, %c0_i32_0 : i32, i32
  }
  func.func @transform_2(%arg0: i32) -> (i32, i32) {
    %c0_i32 = arith.constant 0 : i32
    %c0_i32_0 = arith.constant 0 : i32
    %c0_i32_1 = arith.constant 0 : i32
    return %c0_i32, %c0_i32_0 : i32, i32
  }
  func.func @transform_3(%arg0: i32) -> (i32, i32) {
    %c0_i32 = arith.constant 0 : i32
    %c0_i32_0 = arith.constant 0 : i32
    %c0_i32_1 = arith.constant 0 : i32
    return %c0_i32, %c0_i32_0 : i32, i32
  }
  func.func @transform_4(%arg0: i32) -> (i32, i32) {
    %c0_i32 = arith.constant 0 : i32
    %c0_i32_0 = arith.constant 0 : i32
    %c0_i32_1 = arith.constant 0 : i32
    return %c0_i32, %c0_i32_0 : i32, i32
  }
  func.func @transform_5(%arg0: i32) -> (i32, i32) {
    %c0_i32 = arith.constant 0 : i32
    %c0_i32_0 = arith.constant 0 : i32
    return %c0_i32, %arg0 : i32, i32
  }
}

</mosaic_0001>

<bundles_post_ra>
// kernel: tpu_custom_call.1
= control target key start
LH: loop header
LB: loop body
LE: loop exit
PB: predicated region body
PF: predicated region fallthrough
CT: control target
= control target key end

     0   :  { %s1179_s0 = inlined_call_operand.vmem [shape: f32[200,32], index: 0, kind: input, shape index: {}]   ;;  %s1180_s1 = inlined_call_operand.vmem [shape: f32[32,20], index: 1, kind: input, shape index: {}]   ;;  %s1181_s2 = inlined_call_operand.vmem [shape: f32[1,20], index: 2, kind: input, shape index: {}]   ;;  %s1182_s3 = inlined_call_operand.vmem [shape: f32[1,20], index: 3, kind: input, shape index: {}]   ;;  %s1183_s4 = inlined_call_operand.<no memory space> [shape: f32[1,1], index: 4, kind: input, shape index: {}]   ;;  %s1184_s5 = inlined_call_operand.hbm [shape: f32[1,200], index: 5, kind: output, shape index: {}]  }
   0x1   :  { %v10_v0 = vstv %s1183_s4 }
   0x2   :  { %11 = vst [vmem:[#allocation2] sm:$0x1] %v10_v0 }
   0x3   :  { %v58_v1 = vld [vmem:[%s1180_s1 + $0x18] sm:$0xff]  ;;  %v57_v2 = vld [vmem:[%s1180_s1 + $0x10] sm:$0xff]  ;;  %vm66_vm0 = vcmask 261120   ;;  %v23_v3 = vld [vmem:[%s1179_s0] sm:$0xff] }
   0x4   :  { %787 = vmatprep.subr.mxu0 %v58_v1  ;;  %v56_v4 = vld [vmem:[%s1180_s1 + $0x8] sm:$0xff]  ;;  %795 = vmatprep.mubr.msk.f32.mxu0 %vm66_vm0, %v23_v3  ;;  %v55_v5 = vld [vmem:[%s1180_s1] sm:$0xff]  ;;  %v25_v7 = vld [vmem:[%s1179_s0 + $0x10] sm:$0xff] }
   0x5   :  { %788 = vmatpush3.msra.mxu0 %v58_v1  ;;  %v24_v6 = vld [vmem:[%s1179_s0 + $0x8] sm:$0xff]  ;;  %v26_v8 = vld [vmem:[%s1179_s0 + $0x18] sm:$0xff]  ;;  %v27_v9 = vld [vmem:[%s1179_s0 + $0x20] sm:$0xff] }
   0x6   :  { %789 = vmatprep.subr.mxu0 %v57_v2 }
   0x7   :  { %790 = vmatpush3.msra.mxu0 %v57_v2 }
   0x8   :  { %791 = vmatprep.subr.mxu0 %v56_v4 }
   0x9   :  { %792 = vmatpush3.msra.mxu0 %v56_v4 }
   0xa   :  { %793 = vmatprep.subr.mxu0 %v55_v5 }
   0xb   :  { %794 = vmatpush3.msra.mxu0 %v55_v5 }
   0xc   :  { %796 = vmatmul.mubr.msk.f32.vlgmr.msra.gmra.mxu0 %vm66_vm0, %v24_v6 }
   0xd   :  { %798 = vmatprep.mubr.msk.f32.mxu0 %vm66_vm0, %v25_v7 }
   0xe   :  { %12 = vsyncpa [#allocation4], 0  ;;  %v28_v10 = vld [vmem:[%s1179_s0 + $0x28] sm:$0xff]  ;;  %v29_v11 = vld [vmem:[%s1179_s0 + $0x30] sm:$0xff]  ;;  %vm431_vm1 = vcmask 162816   ;;  %v877_v41 = vmov 0  }
   0xf   :  { %v30_v12 = vld [vmem:[%s1179_s0 + $0x38] sm:$0xff]  ;;  %v31_v13 = vld [vmem:[%s1179_s0 + $0x40] sm:$0xff]  ;;  %v32_v14 = vld [vmem:[%s1179_s0 + $0x48] sm:$0xff]  ;;  %846 = vset.pattern.permute.xlu0 %v877_v41 }
  0x10   :  { %799 = vmatmul.mubr.msk.f32.gmra.mxu0 %vm66_vm0, %v26_v8  ;;  %v33_v15 = vld [vmem:[%s1179_s0 + $0x50] sm:$0xff]  ;;  %v34_v16 = vld [vmem:[%s1179_s0 + $0x58] sm:$0xff]  ;;  %v35_v17 = vld [vmem:[%s1179_s0 + $0x60] sm:$0xff] }
  0x11   :  { %801 = vmatprep.mubr.msk.f32.mxu0 %vm66_vm0, %v27_v9  ;;  %v36_v18 = vld [vmem:[%s1179_s0 + $0x68] sm:$0xff]  ;;  %v37_v19 = vld [vmem:[%s1179_s0 + $0x70] sm:$0xff]  ;;  %v38_v20 = vld [vmem:[%s1179_s0 + $0x78] sm:$0xff] }
  0x12   :  { %v39_v21 = vld [vmem:[%s1179_s0 + $0x80] sm:$0xff]  ;;  %v40_v22 = vld [vmem:[%s1179_s0 + $0x88] sm:$0xff]  ;;  %v41_v23 = vld [vmem:[%s1179_s0 + $0x90] sm:$0xff] }
  0x13   :  { %v42_v24 = vld [vmem:[%s1179_s0 + $0x98] sm:$0xff]  ;;  %v43_v25 = vld [vmem:[%s1179_s0 + $0xa0] sm:$0xff]  ;;  %v44_v26 = vld [vmem:[%s1179_s0 + $0xa8] sm:$0xff] }
  0x14   :  { %802 = vmatmul.mubr.msk.f32.gmra.mxu0 %vm66_vm0, %v28_v10  ;;  %v45_v27 = vld [vmem:[%s1179_s0 + $0xb0] sm:$0xff]  ;;  %v46_v28 = vld [vmem:[%s1179_s0 + $0xb8] sm:$0xff]  ;;  %v47_v29 = vld [vmem:[%s1179_s0 + $0xc0] sm:$0xff] }
  0x15   :  { %804 = vmatprep.mubr.msk.f32.mxu0 %vm66_vm0, %v29_v11  ;;  %v48_v30 = vld [vmem:[%s1179_s0 + $0xc8] sm:$0xff]  ;;  %v49_v31 = vld [vmem:[%s1179_s0 + $0xd0] sm:$0xff]  ;;  %v50_v32 = vld [vmem:[%s1179_s0 + $0xd8] sm:$0xff] }
  0x16   :  { %v51_v33 = vld [vmem:[%s1179_s0 + $0xe0] sm:$0xff]  ;;  %v52_v34 = vld [vmem:[%s1179_s0 + $0xe8] sm:$0xff]  ;;  %v53_v35 = vld [vmem:[%s1179_s0 + $0xf0] sm:$0xff] }
  0x17   :  { %v54_v36 = vld [vmem:[%s1179_s0 + $0xf8] sm:$0xff]  ;;  %v1056_v37 = vld [vmem:[%s1182_s3] sm:$0x1] }
  0x18   :  { %805 = vmatmul.mubr.msk.f32.gmra.mxu0 %vm66_vm0, %v30_v12  ;;  %785 = vmatprep.mubr.msk.f32.mxu1 %vm431_vm1, %v1056_v37  ;;  %v421_v39 = vld [vmem:[#allocation2] sm:$0x1] }
  0x19   :  { %807 = vmatprep.mubr.msk.f32.mxu0 %vm66_vm0, %v31_v13  ;;  %424 = vperm.xlu0 %846, %v421_v39   ;;  %v1093_v6 = vld [vmem:[%s1181_s2] ss:$0 sm:$0xff]  ;;  %s879_s2 = smov [#allocation3]  }
  0x1a   :  { %s643_s13 = sshll.u32 %s879_s2, 4  ;;  %s644_s13 = int_to_ptr.vmem [resolvable:$true] %s643_s13 }
  0x1b   :  { %s855_s14 = scalar_lea.vmem %s644_s13, 32  ;;  %p860_p1 = scmp.lt.s32.totalorder %s644_s13, %s644_s13 }
  0x1c   :  { %808 = vmatmul.mubr.msk.f32.gmra.mxu0 %vm66_vm0, %v32_v14  ;;  %p856_p0 = scmp.ne.s32.totalorder %s644_s13, %s855_s14  ;;  %p861_p2 = scmp.lt.s32.totalorder %s855_s14, %s855_s14 }
  0x1d   :  { %810 = vmatprep.mubr.msk.f32.mxu0 %vm66_vm0, %v33_v15 }
  0x1e   :  { %p862_p3 = por %p861_p2, %p860_p1 }
  0x20   :  { %811 = vmatmul.mubr.msk.f32.gmra.mxu0 %vm66_vm0, %v34_v16  ;;  %p863_p4 = pnand %p862_p3, %p856_p0 }
  0x21   :  { %813 = vmatprep.mubr.msk.f32.mxu0 %vm66_vm0, %v35_v17 }
  0x24   :  { %814 = vmatmul.mubr.msk.f32.gmra.mxu0 %vm66_vm0, %v36_v18 }
  0x25   :  { %816 = vmatprep.mubr.msk.f32.mxu0 %vm66_vm0, %v37_v19 }
  0x28   :  { %817 = vmatmul.mubr.msk.f32.gmra.mxu0 %vm66_vm0, %v38_v20 }
  0x29   :  { %819 = vmatprep.mubr.msk.f32.mxu0 %vm66_vm0, %v39_v21 }
  0x2c   :  { %820 = vmatmul.mubr.msk.f32.gmra.mxu0 %vm66_vm0, %v40_v22 }
  0x2d   :  { %822 = vmatprep.mubr.msk.f32.mxu0 %vm66_vm0, %v41_v23 }
  0x30   :  { %823 = vmatmul.mubr.msk.f32.gmra.mxu0 %vm66_vm0, %v42_v24 }
  0x31   :  { %825 = vmatprep.mubr.msk.f32.mxu0 %vm66_vm0, %v43_v25 }
  0x34   :  { %826 = vmatmul.mubr.msk.f32.gmra.mxu0 %vm66_vm0, %v44_v26 }
  0x35   :  { %828 = vmatprep.mubr.msk.f32.mxu0 %vm66_vm0, %v45_v27 }
  0x38   :  { %829 = vmatmul.mubr.msk.f32.gmra.mxu0 %vm66_vm0, %v46_v28 }
  0x39   :  { %831 = vmatprep.mubr.msk.f32.mxu0 %vm66_vm0, %v47_v29 }
  0x3c   :  { %832 = vmatmul.mubr.msk.f32.gmra.mxu0 %vm66_vm0, %v48_v30 }
  0x3d   :  { %834 = vmatprep.mubr.msk.f32.mxu0 %vm66_vm0, %v49_v31 }
  0x40   :  { %835 = vmatmul.mubr.msk.f32.gmra.mxu0 %vm66_vm0, %v50_v32 }
  0x41   :  { %837 = vmatprep.mubr.msk.f32.mxu0 %vm66_vm0, %v51_v33 }
  0x44   :  { %838 = vmatmul.mubr.msk.f32.gmra.mxu0 %vm66_vm0, %v52_v34 }
  0x45   :  { %840 = vmatprep.mubr.msk.f32.mxu0 %vm66_vm0, %v53_v35 }
  0x48   :  { %841 = vmatmul.mubr.msk.f32.gmra.mxu0 %vm66_vm0, %v54_v36 }
  0xcc   :  { %v1060_v38 = vpop.f32.mrf.mxu0 }
  0xce   :  { %v1062_v40 = vpop.f32.mrf.mxu0 }
  0xd0   :  { %v1064_v42 = vpop.f32.mrf.mxu0 }
  0xd2   :  { %v1066_v43 = vpop.f32.mrf.mxu0 }
  0xd4   :  { %v1068_v44 = vpop.f32.mrf.mxu0 }
  0xd6   :  { %v1070_v45 = vpop.f32.mrf.mxu0 }
  0xd8   :  { %v1072_v46 = vpop.f32.mrf.mxu0 }
  0xda   :  { %v1074_v47 = vpop.f32.mrf.mxu0 }
  0xdc   :  { %v809_v48 = vpop.f32.mrf.mxu0 }
  0xdd   :  { %v275_v33 = vadd.f32 %v809_v48, %v1093_v6  ;;  %v265_v48 = vadd.f32 %v1072_v46, %v1093_v6  ;;  %v255_v46 = vadd.f32 %v1068_v44, %v1093_v6  ;;  %v245_v44 = vadd.f32 %v1064_v42, %v1093_v6 }
  0xde   :  { %v1076_v49 = vpop.f32.mrf.mxu0  ;;  %v235_v42 = vadd.f32 %v1060_v38, %v1093_v6  ;;  %v427_v38 = vlaneseq }
  0xdf   :  { %v397_v39 = vmax.f32 %v275_v33, 0.0  ;;  %v270_v41 = vadd.f32 %v1093_v6, %v1076_v49  ;;  %v260_v49 = vadd.f32 %v1093_v6, %v1074_v47  ;;  %v393_v47 = vmax.f32 %v255_v46, 0.0 }
  0xe0   :  { %v812_v50 = vpop.f32.mrf.mxu0  ;;  %vm634_vm2 = vcmp.lt.s32.totalorder %v427_v38, 256 }
  0xe1   :  { %v285_v25 = vadd.f32 %v812_v50, %v1093_v6 }
  0xe2   :  { %v279_v51 = vpop.f32.mrf.mxu0 }
  0xe3   :  { %v399_v29 = vmax.f32 %v285_v25, 0.0  ;;  %v280_v30 = vadd.f32 %v1093_v6, %v279_v51 }
  0xe4   :  { %v815_v52 = vpop.f32.mrf.mxu0 }
  0xe5   :  { %v295_v17 = vadd.f32 %v815_v52, %v1093_v6  ;;  %v398_v34 = vmax.f32 %v280_v30, 0.0  ;;  %v396_v52 = vmax.f32 %v270_v41, 0.0 }
  0xe6   :  { %v289_v53 = vpop.f32.mrf.mxu0 }
  0xe7   :  { %v401_v21 = vmax.f32 %v295_v17, 0.0  ;;  %v290_v22 = vadd.f32 %v1093_v6, %v289_v53 }
  0xe8   :  { %v818_v54 = vpop.f32.mrf.mxu0 }
  0xe9   :  { %v305_v7 = vadd.f32 %v818_v54, %v1093_v6  ;;  %v400_v26 = vmax.f32 %v290_v22, 0.0 }
  0xea   :  { %v299_v55 = vpop.f32.mrf.mxu0 }
  0xeb   :  { %v403_v13 = vmax.f32 %v305_v7, 0.0  ;;  %v300_v14 = vadd.f32 %v1093_v6, %v299_v55  ;;  %v395_v55 = vmax.f32 %v265_v48, 0.0 }
  0xec   :  { %v1078_v56 = vpop.f32.mrf.mxu0 }
  0xed   :  { %v402_v18 = vmax.f32 %v300_v14, 0.0 }
  0xee   :  { %v1080_v57 = vpop.f32.mrf.mxu0 }
  0xf0   :  { %v1082_v58 = vpop.f32.mrf.mxu0 }
  0xf2   :  { %v1084_v59 = vpop.f32.mrf.mxu0 }
  0xf3   :  { %v320_v7 = vadd.f32 %v1093_v6, %v1084_v59 }
  0xf4   :  { %v1086_v60 = vpop.f32.mrf.mxu0 }
  0xf6   :  { %v1088_v61 = vpop.f32.mrf.mxu0 }
  0xf8   :  { %v830_v62 = vpop.f32.mrf.mxu0 }
  0xf9   :  { %v345_v50 = vadd.f32 %v830_v62, %v1093_v6  ;;  %v335_v62 = vadd.f32 %v1086_v60, %v1093_v6  ;;  %v250_v60 = vadd.f32 %v1093_v6, %v1070_v45  ;;  %v391_v45 = vmax.f32 %v245_v44, 0.0 }
  0xfa   :  { %v339_v63 = vpop.f32.mrf.mxu0 }
  0xfb   :  { %v411_v53 = vmax.f32 %v345_v50, 0.0  ;;  %v340_v54 = vadd.f32 %v1093_v6, %v339_v63  ;;  %v394_v63 = vmax.f32 %v260_v49, 0.0 }
  0xfc   :  { %v833_v0 = vpop.f32.mrf.mxu0 }
  0xfd   :  { %v355_v31 = vadd.f32 %v833_v0, %v1093_v6  ;;  %v410_v0 = vmax.f32 %v340_v54, 0.0 }
  0xfe   :  { %v349_v1 = vpop.f32.mrf.mxu0 }
  0xff   :  { %v413_v35 = vmax.f32 %v355_v31, 0.0  ;;  %v350_v36 = vadd.f32 %v1093_v6, %v349_v1  ;;  %v409_v1 = vmax.f32 %v335_v62, 0.0 }
 0x100   :  { %v836_v2 = vpop.f32.mrf.mxu0 }
 0x101   :  { %v365_v23 = vadd.f32 %v836_v2, %v1093_v6  ;;  %v412_v51 = vmax.f32 %v350_v36, 0.0  ;;  %v330_v2 = vadd.f32 %v1093_v6, %v1088_v61  ;;  %v392_v61 = vmax.f32 %v250_v60, 0.0 }
 0x102   :  { %v359_v3 = vpop.f32.mrf.mxu0 }
 0x103   :  { %v415_v27 = vmax.f32 %v365_v23, 0.0  ;;  %v360_v28 = vadd.f32 %v1093_v6, %v359_v3  ;;  %v325_v3 = vadd.f32 %v1082_v58, %v1093_v6  ;;  %v240_v58 = vadd.f32 %v1093_v6, %v1066_v43 }
 0x104   :  { %v839_v4 = vpop.f32.mrf.mxu0  ;;  %v389_v43 = vmax.f32 %v235_v42, 0.0 }
 0x105   :  { %v375_v15 = vadd.f32 %v839_v4, %v1093_v6  ;;  %v414_v32 = vmax.f32 %v360_v28, 0.0  ;;  %v408_v4 = vmax.f32 %v330_v2, 0.0  ;;  %v390_v59 = vmax.f32 %v240_v58, 0.0 }
 0x106   :  { %v369_v5 = vpop.f32.mrf.mxu0 }
 0x107   :  { %v417_v19 = vmax.f32 %v375_v15, 0.0  ;;  %v370_v20 = vadd.f32 %v1093_v6, %v369_v5  ;;  %v407_v5 = vmax.f32 %v325_v3, 0.0  ;;  %v425_v15 = vpop.permute.xlu0 %424 }
 0x108   :  { %v842_v8 = vpop.f32.mrf.mxu0 }
 0x109   :  { %v385_v9 = vadd.f32 %v842_v8, %v1093_v6  ;;  %v416_v24 = vmax.f32 %v370_v20, 0.0  ;;  %v315_v8 = vadd.f32 %v1078_v56, %v1093_v6  ;;  %v230_v56 = vadd.f32 %v1093_v6, %v1062_v40 }
 0x10a   :  { %v379_v10 = vpop.f32.mrf.mxu0 }
 0x10b   :  { %v419_v11 = vmax.f32 %v385_v9, 0.0  ;;  %v380_v12 = vadd.f32 %v1093_v6, %v379_v10  ;;  %v406_v9 = vmax.f32 %v320_v7, 0.0  ;;  %v405_v10 = vmax.f32 %v315_v8, 0.0 }
 0x10d   :  { %v418_v16 = vmax.f32 %v380_v12, 0.0  ;;  %753 = vmatprep.subr.msk.mxu1 %vm431_vm1, %v419_v11  ;;  %v310_v11 = vadd.f32 %v1093_v6, %v1080_v57  ;;  %v428_v57 = vshrl.u32 %v427_v38, 7 }
 0x10e   :  { %754 = vmatpush3.xpose.msk.msra.mxu1 %vm431_vm1, %v403_v13  ;;  %v388_v13 = vmax.f32 %v230_v56, 0.0 }
 0x10f   :  { %755 = vmatprep.subr.msk.mxu1 %vm431_vm1, %v418_v16  ;;  %v404_v12 = vmax.f32 %v310_v11, 0.0  ;;  %v429_v14 = vsub.s32 0, %v428_v57 }
 0x111   :  { %v430_v16 = vrot.slane %v425_v15, %v429_v14 }
 0x112   :  { %756 = vmatpush3.xpose.msk.msra.mxu1 %vm431_vm1, %v402_v18 }
 0x113   :  { %757 = vmatprep.subr.msk.mxu1 %vm431_vm1, %v417_v19 }
 0x116   :  { %758 = vmatpush3.xpose.msk.msra.mxu1 %vm431_vm1, %v401_v21 }
 0x117   :  { %759 = vmatprep.subr.msk.mxu1 %vm431_vm1, %v416_v24 }
 0x11a   :  { %760 = vmatpush3.xpose.msk.msra.mxu1 %vm431_vm1, %v400_v26 }
 0x11b   :  { %761 = vmatprep.subr.msk.mxu1 %vm431_vm1, %v415_v27 }
 0x11e   :  { %762 = vmatpush3.xpose.msk.msra.mxu1 %vm431_vm1, %v399_v29 }
 0x11f   :  { %763 = vmatprep.subr.msk.mxu1 %vm431_vm1, %v414_v32 }
 0x122   :  { %764 = vmatpush3.xpose.msk.msra.mxu1 %vm431_vm1, %v398_v34 }
 0x123   :  { %765 = vmatprep.subr.msk.mxu1 %vm431_vm1, %v413_v35 }
 0x126   :  { %766 = vmatpush3.xpose.msk.msra.mxu1 %vm431_vm1, %v397_v39 }
 0x127   :  { %767 = vmatprep.subr.msk.mxu1 %vm431_vm1, %v412_v51 }
 0x12a   :  { %768 = vmatpush3.xpose.msk.msra.mxu1 %vm431_vm1, %v396_v52 }
 0x12b   :  { %769 = vmatprep.subr.msk.mxu1 %vm431_vm1, %v411_v53 }
 0x12e   :  { %770 = vmatpush3.xpose.msk.msra.mxu1 %vm431_vm1, %v395_v55 }
 0x12f   :  { %771 = vmatprep.subr.msk.mxu1 %vm431_vm1, %v410_v0 }
 0x132   :  { %772 = vmatpush3.xpose.msk.msra.mxu1 %vm431_vm1, %v394_v63 }
 0x133   :  { %773 = vmatprep.subr.msk.mxu1 %vm431_vm1, %v409_v1 }
 0x136   :  { %774 = vmatpush3.xpose.msk.msra.mxu1 %vm431_vm1, %v393_v47 }
 0x137   :  { %775 = vmatprep.subr.msk.mxu1 %vm431_vm1, %v408_v4 }
 0x13a   :  { %776 = vmatpush3.xpose.msk.msra.mxu1 %vm431_vm1, %v392_v61 }
 0x13b   :  { %777 = vmatprep.subr.msk.mxu1 %vm431_vm1, %v407_v5 }
 0x13e   :  { %778 = vmatpush3.xpose.msk.msra.mxu1 %vm431_vm1, %v391_v45 }
 0x13f   :  { %779 = vmatprep.subr.msk.mxu1 %vm431_vm1, %v406_v9 }
 0x142   :  { %780 = vmatpush3.xpose.msk.msra.mxu1 %vm431_vm1, %v390_v59 }
 0x143   :  { %781 = vmatprep.subr.msk.mxu1 %vm431_vm1, %v405_v10 }
 0x146   :  { %782 = vmatpush3.xpose.msk.msra.mxu1 %vm431_vm1, %v389_v43 }
 0x147   :  { %783 = vmatprep.subr.msk.mxu1 %vm431_vm1, %v404_v12 }
 0x14a   :  { %784 = vmatpush3.xpose.msk.msra.mxu1 %vm431_vm1, %v388_v13 }
 0x14d   :  { %786 = vmatmul.mubr.msk.f32.vlgmr.msra.gmra.mxu1 %vm431_vm1, %v1056_v37  ;;  %v878_v37 = vmov 1966171168  }
 0x14e   :  { %v618_v27 = vunpack.c.l.s4 %v878_v37 }
 0x150   :  { %v619_v28 = vunpack.c.0.s8 %v618_v27 }
 0x152   :  { %v622_v30 = vsub.s32 %v619_v28, %v428_v57 }
 0x20d   :  { %v597_v17 = vpop.f32.mrf.mxu1 }
 0x20e   :  { %v598_v18 = vadd.f32 %v597_v17, %v430_v16 }
 0x20f   :  { %v599_v19 = vpop.f32.mrf.mxu1 }
 0x210   :  { %v602_v40 = vsub.f32 0.0, %v598_v18  ;;  %v600_v6 = vadd.f32 %v599_v19, %v430_v16 }
 0x212   :  { %v604_v20 = vmul.f32 1.442695, %v602_v40  ;;  %v603_v21 = vsub.f32 0.0, %v600_v6 }
 0x214   :  { %847 = vpow2.f32 %v604_v20  ;;  %v606_v22 = vmul.f32 1.442695, %v603_v21 }
 0x216   :  { %849 = vpow2.f32 %v606_v22 }
 0x221   :  { %v848_v23 = vpop.eup %847 }
 0x222   :  { %v608_v24 = vadd.f32 1.0, %v848_v23 }
 0x223   :  { %v850_v25 = vpop.eup %849 }
 0x224   :  { %v609_v26 = vadd.f32 1.0, %v850_v25  ;;  %851 = vrcp.f32 %v608_v24 }
 0x226   :  { %853 = vrcp.f32 %v609_v26 }
 0x231   :  { %v852_v29 = vpop.eup %851 }
 0x233   :  { %v854_v31 = vpop.eup %853 }
 0x234   :  { %v616_v32 = vcombine.low %v852_v29, %v854_v31 }
 0x236   :  { %v623_v33 = vrot.slane %v616_v32, %v622_v30 }
 0x238   :  { %v630_v34 = vrot.slane %v623_v33, %v622_v30 }
 0x23a   :  { %636 = vst.msk [vmem:[#allocation3] sm:$0x3] %vm634_vm2, %v630_v34 }
 0x23b   :  { %866 = shalt.err (!%p863_p4)
}
 0x23c   :  { %646 = dma.vmem_to_hbm [thread:$0]  %s644_s13, 32, %s1184_s5, [#allocation4]  }
 0x23d   :  { %875 = dma.done.wait [#allocation4], 32  }
 0x23e   :  { %876 = vsyncadd [#allocation4], 4294967264 }
 0x23f   :  { %650 = vsyncpa [#allocation4], 1 }

</bundles_post_ra>
